<compile_context>
chip_gen: v6e
topology: v6e:2x2x1
jax: 0.10.0
libtpu: 0.0.40
codegen_flags: <defaults>
</compile_context>

<pallas_src>
import math

import jax
import jax.numpy as jnp
from jax.experimental import pallas as pl
from jax.experimental.pallas import tpu as pltpu


def _loha_kernel(x_ref, w1aT_ref, w1bT_ref, w2aT_ref, w2bT_ref, o_ref, acc_ref):
    k = pl.program_id(2)

    @pl.when(k == 0)
    def _():
        acc_ref[...] = jnp.zeros_like(acc_ref)

    # Build the effective transposed-weight tile in native (K, N) orientation.
    # (rank is tiny, so these MXU matmuls are ~2*rank/tm of the main matmul.)
    w1 = jnp.dot(w1bT_ref[...], w1aT_ref[...], preferred_element_type=jnp.float32)
    w2 = jnp.dot(w2bT_ref[...], w2aT_ref[...], preferred_element_type=jnp.float32)
    wT = (w1 * w2).astype(x_ref.dtype)          # (tk, tn); scale already folded into w1a

    # Hot matmul: (tm, tk) @ (tk, tn), f32 accumulation.
    acc_ref[...] += jnp.dot(x_ref[...], wT, preferred_element_type=jnp.float32)

    @pl.when(k == pl.num_programs(2) - 1)
    def _():
        o_ref[...] = acc_ref[...].astype(o_ref.dtype)


def _round_up(x, m):
    return (x + m - 1) // m * m


def loha_forward(hidden_states, w1a, w1b, w2a, w2b, scale=1.0,
                 tm_target=256, tn_target=256, tk_target=512):
    """hidden_states: (..., in_features) -> (..., out_features)."""
    in_features = hidden_states.shape[-1]
    out_features, rank = w1a.shape
    assert w1b.shape == (rank, in_features)
    assert w2a.shape == (out_features, rank)
    assert w2b.shape == (rank, in_features)

    lead = hidden_states.shape[:-1]
    M = int(math.prod(lead)) if lead else 1
    x2d = hidden_states.reshape(M, in_features)

    # Fold scale into one factor once (one-time (N, rank) multiply in XLA).
    w1a = w1a * jnp.asarray(scale, w1a.dtype)

    # Pre-transpose the tiny rank-factors so the kernel builds W^T directly.
    w1aT = w1a.T   # (rank, N)
    w1bT = w1b.T   # (K, rank)
    w2aT = w2a.T   # (rank, N)
    w2bT = w2b.T   # (K, rank)

    # Tile selection: lane dims (tn, tk) multiples of 128, sublane (tm) of 8.
    tm = min(tm_target, _round_up(M, 8))
    tn = min(tn_target, _round_up(out_features, 128))
    tk = min(tk_target, _round_up(in_features, 128))

    Mp = _round_up(M, tm)
    Np = _round_up(out_features, tn)
    Kp = _round_up(in_features, tk)

    # Zero-pad to tile multiples; padded K rows / N cols / M rows contribute
    # zeros and are sliced off at the end.
    x2d = jnp.pad(x2d, ((0, Mp - M), (0, Kp - in_features)))
    w1aT = jnp.pad(w1aT, ((0, 0), (0, Np - out_features)))
    w2aT = jnp.pad(w2aT, ((0, 0), (0, Np - out_features)))
    w1bT = jnp.pad(w1bT, ((0, Kp - in_features), (0, 0)))
    w2bT = jnp.pad(w2bT, ((0, Kp - in_features), (0, 0)))

    grid = (Mp // tm, Np // tn, Kp // tk)

    out2d = pl.pallas_call(
        _loha_kernel,
        out_shape=jax.ShapeDtypeStruct((Mp, Np), hidden_states.dtype),
        grid_spec=pltpu.PrefetchScalarGridSpec(
            num_scalar_prefetch=0,
            grid=grid,
            in_specs=[
                pl.BlockSpec((tm, tk), lambda m, n, k: (m, k)),    # x
                pl.BlockSpec((rank, tn), lambda m, n, k: (0, n)),  # w1a^T
                pl.BlockSpec((tk, rank), lambda m, n, k: (k, 0)),  # w1b^T
                pl.BlockSpec((rank, tn), lambda m, n, k: (0, n)),  # w2a^T
                pl.BlockSpec((tk, rank), lambda m, n, k: (k, 0)),  # w2b^T
            ],
            out_specs=pl.BlockSpec((tm, tn), lambda m, n, k: (m, n)),
            scratch_shapes=[pltpu.VMEM((tm, tn), jnp.float32)],
        ),
        compiler_params=pltpu.CompilerParams(
            dimension_semantics=("parallel", "parallel", "arbitrary"),
        ),
    )(x2d, w1aT, w1bT, w2aT, w2bT)

    return out2d[:M, :out_features].reshape(*lead, out_features)


def loha_reference(hidden_states, w1a, w1b, w2a, w2b, scale=1.0):
    new_weight = (w1a @ w1b) * (w2a @ w2b) * scale
    return hidden_states @ new_weight.T


if __name__ == "__main__":
    # Small synthetic shapes consistent with the module's forward.
    batch, seq = 2, 8
    in_features, out_features, rank = 32, 32, 4

    key = jax.random.PRNGKey(0)
    k_x, k_w1a, k_w1b, k_w2b = jax.random.split(key, 4)

    hidden_states = jax.random.normal(k_x, (batch, seq, in_features), jnp.float32)

    # Deterministic init mirroring LoHA.__init__:
    #   loha_w1_b.weight ~ N(0, 1)    (rank, in_features)
    #   loha_w1_a.weight ~ N(0, 0.1)  (out_features, rank)
    #   loha_w2_b.weight ~ N(0, 1)    (rank, in_features)
    #   loha_w2_a.weight = 0          (out_features, rank)
    w1b = jax.random.normal(k_w1b, (rank, in_features), jnp.float32)
    w1a = 0.1 * jax.random.normal(k_w1a, (out_features, rank), jnp.float32)
    w2b = jax.random.normal(k_w2b, (rank, in_features), jnp.float32)
    w2a = jnp.zeros((out_features, rank), jnp.float32)

    out = loha_forward(hidden_states, w1a, w1b, w2a, w2b)
    out = jax.block_until_ready(out)
    ref = loha_reference(hidden_states, w1a, w1b, w2a, w2b)
    assert out.shape == (batch, seq, out_features)
    assert jnp.allclose(out, ref, atol=1e-5, rtol=1e-5)

    # Sanity check with non-degenerate w2a + non-unit scale (module init zeros
    # w2a, which makes the official output identically 0).
    w2a_nz = 0.05 * jax.random.normal(jax.random.PRNGKey(1), (out_features, rank), jnp.float32)
    out_nz = jax.block_until_ready(
        loha_forward(hidden_states, w1a, w1b, w2a_nz, w2b, scale=0.5))
    ref_nz = loha_reference(hidden_states, w1a, w1b, w2a_nz, w2b, scale=0.5)
    assert jnp.allclose(out_nz, ref_nz, atol=1e-4, rtol=1e-4)

    # Exercise the multi-tile (m, n, k) path with small tile targets:
    # grid = (2, 2, 2) with 256-wide in/out features.
    K2, N2 = 256, 256
    kk = jax.random.split(jax.random.PRNGKey(2), 5)
    x2 = jax.random.normal(kk[0], (batch, seq, K2), jnp.float32)
    w1a2 = 0.1 * jax.random.normal(kk[1], (N2, rank), jnp.float32)
    w1b2 = jax.random.normal(kk[2], (rank, K2), jnp.float32)
    w2a2 = 0.05 * jax.random.normal(kk[3], (N2, rank), jnp.float32)
    w2b2 = jax.random.normal(kk[4], (rank, K2), jnp.float32)
    out2 = jax.block_until_ready(
        loha_forward(x2, w1a2, w1b2, w2a2, w2b2, scale=2.0,
                     tm_target=8, tn_target=128, tk_target=128))
    ref2 = loha_reference(x2, w1a2, w1b2, w2a2, w2b2, scale=2.0)
    assert jnp.allclose(out2, ref2, atol=1e-3, rtol=1e-3)

    print("KERNEL_OK")
</pallas_src>

<mosaic_0001>
module attributes {stable_mosaic.version = 11 : i64} {
  func.func @_loha_kernel(%arg0: i32, %arg1: i32, %arg2: i32, %arg3: memref<16x128xf32, #tpu.memory_space<vmem>>, %arg4: memref<4x128xf32, #tpu.memory_space<vmem>>, %arg5: memref<128x4xf32, #tpu.memory_space<vmem>>, %arg6: memref<4x128xf32, #tpu.memory_space<vmem>>, %arg7: memref<128x4xf32, #tpu.memory_space<vmem>>, %arg8: memref<16x128xf32, #tpu.memory_space<vmem>>, %arg9: memref<16x128xf32, #tpu.memory_space<vmem>>) attributes {dimension_semantics = [#tpu.dimension_semantics<parallel>, #tpu.dimension_semantics<parallel>, #tpu.dimension_semantics<arbitrary>], iteration_bounds = array<i64: 1, 1, 1>, scalar_prefetch = 0 : i64, scratch_operands = 1 : i64, tpu.core_type = #tpu.core_type<tc>, window_params = [{transform_indices = @transform_0, window_bounds = array<i64: 16, 128>}, {transform_indices = @transform_1, window_bounds = array<i64: 4, 128>}, {transform_indices = @transform_2, window_bounds = array<i64: 128, 4>}, {transform_indices = @transform_3, window_bounds = array<i64: 4, 128>}, {transform_indices = @transform_4, window_bounds = array<i64: 128, 4>}, {transform_indices = @transform_5, window_bounds = array<i64: 16, 128>}]} {
    %c0_i32 = arith.constant 0 : i32
    %0 = arith.cmpi eq, %arg2, %c0_i32 : i32
    %1 = arith.extui %0 : i1 to i32
    %c0_i32_0 = arith.constant 0 : i32
    %2 = arith.cmpi ne, %1, %c0_i32_0 : i32
    scf.if %2 {
      %cst_18 = arith.constant 0.000000e+00 : f32
      %18 = vector.broadcast %cst_18 : f32 to vector<16x128xf32>
      %c0_19 = arith.constant 0 : index
      %c0_20 = arith.constant 0 : index
      %19 = vector.load %arg9[%c0_19, %c0_20] : memref<16x128xf32, #tpu.memory_space<vmem>>, vector<16x128xf32>
      tpu.vector_store %arg9[%c0_19, %c0_20], %18 {strides = array<i32>} : memref<16x128xf32, #tpu.memory_space<vmem>>, vector<16x128xf32>,
    } else {
    }
    %c0 = arith.constant 0 : index
    %c0_1 = arith.constant 0 : index
    %3 = vector.load %arg5[%c0, %c0_1] : memref<128x4xf32, #tpu.memory_space<vmem>>, vector<128x4xf32>
    %c0_2 = arith.constant 0 : index
    %c0_3 = arith.constant 0 : index
    %4 = vector.load %arg4[%c0_2, %c0_3] : memref<4x128xf32, #tpu.memory_space<vmem>>, vector<4x128xf32>
    %cst = arith.constant dense<0.000000e+00> : vector<128x128xf32>
    %5 = tpu.matmul %3, %4, %cst {dimension_numbers = #tpu.dot_dimension_numbers<[1], [0], [0], [1], [0, 0, 1, 1], [], []>} : vector<128x4xf32>, vector<4x128xf32>, vector<128x128xf32> -> vector<128x128xf32>
    %c0_4 = arith.constant 0 : index
    %c0_5 = arith.constant 0 : index
    %6 = vector.load %arg7[%c0_4, %c0_5] : memref<128x4xf32, #tpu.memory_space<vmem>>, vector<128x4xf32>
    %c0_6 = arith.constant 0 : index
    %c0_7 = arith.constant 0 : index
    %7 = vector.load %arg6[%c0_6, %c0_7] : memref<4x128xf32, #tpu.memory_space<vmem>>, vector<4x128xf32>
    %cst_8 = arith.constant dense<0.000000e+00> : vector<128x128xf32>
    %8 = tpu.matmul %6, %7, %cst_8 {dimension_numbers = #tpu.dot_dimension_numbers<[1], [0], [0], [1], [0, 0, 1, 1], [], []>} : vector<128x4xf32>, vector<4x128xf32>, vector<128x128xf32> -> vector<128x128xf32>
    %9 = arith.mulf %5, %8 : vector<128x128xf32>
    %c0_9 = arith.constant 0 : index
    %c0_10 = arith.constant 0 : index
    %10 = vector.load %arg9[%c0_9, %c0_10] : memref<16x128xf32, #tpu.memory_space<vmem>>, vector<16x128xf32>
    %c0_11 = arith.constant 0 : index
    %c0_12 = arith.constant 0 : index
    %11 = vector.load %arg3[%c0_11, %c0_12] : memref<16x128xf32, #tpu.memory_space<vmem>>, vector<16x128xf32>
    %cst_13 = arith.constant dense<0.000000e+00> : vector<16x128xf32>
    %12 = tpu.matmul %11, %9, %cst_13 {dimension_numbers = #tpu.dot_dimension_numbers<[1], [0], [0], [1], [0, 0, 1, 1], [], []>} : vector<16x128xf32>, vector<128x128xf32>, vector<16x128xf32> -> vector<16x128xf32>
    %13 = arith.addf %10, %12 : vector<16x128xf32>
    %c0_14 = arith.constant 0 : index
    %c0_15 = arith.constant 0 : index
    %14 = vector.load %arg9[%c0_14, %c0_15] : memref<16x128xf32, #tpu.memory_space<vmem>>, vector<16x128xf32>
    tpu.vector_store %arg9[%c0_14, %c0_15], %13 {strides = array<i32>} : memref<16x128xf32, #tpu.memory_space<vmem>>, vector<16x128xf32>,
    %c0_i32_16 = arith.constant 0 : i32
    %15 = arith.cmpi eq, %arg2, %c0_i32_16 : i32
    %16 = arith.extui %15 : i1 to i32
    %c0_i32_17 = arith.constant 0 : i32
    %17 = arith.cmpi ne, %16, %c0_i32_17 : i32
    scf.if %17 {
      %c0_18 = arith.constant 0 : index
      %c0_19 = arith.constant 0 : index
      %18 = vector.load %arg9[%c0_18, %c0_19] : memref<16x128xf32, #tpu.memory_space<vmem>>, vector<16x128xf32>
      %c0_20 = arith.constant 0 : index
      %c0_21 = arith.constant 0 : index
      %19 = vector.load %arg8[%c0_20, %c0_21] : memref<16x128xf32, #tpu.memory_space<vmem>>, vector<16x128xf32>
      tpu.vector_store %arg8[%c0_20, %c0_21], %18 {strides = array<i32>} : memref<16x128xf32, #tpu.memory_space<vmem>>, vector<16x128xf32>,
    } else {
    }
    return
  }
  func.func @transform_0(%arg0: i32, %arg1: i32, %arg2: i32) -> (i32, i32) {
    %c0_i32 = arith.constant 0 : i32
    return %arg0, %arg2 : i32, i32
  }
  func.func @transform_1(%arg0: i32, %arg1: i32, %arg2: i32) -> (i32, i32) {
    %c0_i32 = arith.constant 0 : i32
    %c0_i32_0 = arith.constant 0 : i32
    return %c0_i32, %arg1 : i32, i32
  }
  func.func @transform_2(%arg0: i32, %arg1: i32, %arg2: i32) -> (i32, i32) {
    %c0_i32 = arith.constant 0 : i32
    %c0_i32_0 = arith.constant 0 : i32
    return %arg2, %c0_i32 : i32, i32
  }
  func.func @transform_3(%arg0: i32, %arg1: i32, %arg2: i32) -> (i32, i32) {
    %c0_i32 = arith.constant 0 : i32
    %c0_i32_0 = arith.constant 0 : i32
    return %c0_i32, %arg1 : i32, i32
  }
  func.func @transform_4(%arg0: i32, %arg1: i32, %arg2: i32) -> (i32, i32) {
    %c0_i32 = arith.constant 0 : i32
    %c0_i32_0 = arith.constant 0 : i32
    return %arg2, %c0_i32 : i32, i32
  }
  func.func @transform_5(%arg0: i32, %arg1: i32, %arg2: i32) -> (i32, i32) {
    %c0_i32 = arith.constant 0 : i32
    return %arg0, %arg1 : i32, i32
  }
}

</mosaic_0001>

<bundles_post_ra>
// kernel: tpu_custom_call.1
= control target key start
LH: loop header
LB: loop body
LE: loop exit
PB: predicated region body
PF: predicated region fallthrough
CT: control target
= control target key end

     0   :  { %vm93_vm0 = vcmask 1043456   ;;  %vm44_vm1 = vcmask 31744   ;;  %s966_s0 = inlined_call_operand.vmem [shape: f32[16,128], index: 0, kind: input, shape index: {}]   ;;  %s967_s1 = inlined_call_operand.vmem [shape: f32[4,128], index: 1, kind: input, shape index: {}]   ;;  %s968_s2 = inlined_call_operand.vmem [shape: f32[128,4], index: 2, kind: input, shape index: {}]   ;;  %s969_s3 = inlined_call_operand.vmem [shape: f32[4,128], index: 3, kind: input, shape index: {}]   ;;  %s970_s4 = inlined_call_operand.vmem [shape: f32[128,4], index: 4, kind: input, shape index: {}]   ;;  %s971_s5 = inlined_call_operand.hbm [shape: f32[16,128], index: 5, kind: output, shape index: {}]  }
   0x1   :  { %v43_v0 = vld [vmem:[%s967_s1] sm:$0xf]  ;;  %v28_v4 = vld [vmem:[%s968_s2 + $0x8] sm:$0xff]  ;;  %v29_v6 = vld [vmem:[%s968_s2 + $0x10] sm:$0xff] }
   0x2   :  { %v258_v1 = vld [vmem:[%s969_s3] sm:$0xf]  ;;  %663 = vmatprep.subr.msk.mxu0 %vm93_vm0, %v43_v0  ;;  %v243_v5 = vld [vmem:[%s970_s4 + $0x8] sm:$0xff]  ;;  %v244_v7 = vld [vmem:[%s970_s4 + $0x10] sm:$0xff] }
   0x3   :  { %v27_v2 = vld [vmem:[%s968_s2] sm:$0xff]  ;;  %689 = vmatprep.subr.msk.mxu1 %vm93_vm0, %v258_v1  ;;  %664 = vmatpush3.msk.msra.mxu0 %vm93_vm0, %v43_v0  ;;  %v30_v8 = vld [vmem:[%s968_s2 + $0x18] sm:$0xff]  ;;  %v32_v12 = vld [vmem:[%s968_s2 + $0x28] sm:$0xff] }
   0x4   :  { %v242_v3 = vld [vmem:[%s970_s4] sm:$0xff]  ;;  %665 = vmatprep.mubr.msk.f32.mxu0 %vm44_vm1, %v27_v2  ;;  %690 = vmatpush3.msk.msra.mxu1 %vm93_vm0, %v258_v1  ;;  %v245_v9 = vld [vmem:[%s970_s4 + $0x18] sm:$0xff]  ;;  %v247_v13 = vld [vmem:[%s970_s4 + $0x28] sm:$0xff] }
   0x5   :  { %691 = vmatprep.mubr.msk.f32.mxu1 %vm44_vm1, %v242_v3  ;;  %666 = vmatmul.mubr.msk.f32.vlgmr.msra.gmra.mxu0 %vm44_vm1, %v28_v4  ;;  %v31_v10 = vld [vmem:[%s968_s2 + $0x20] sm:$0xff]  ;;  %v33_v14 = vld [vmem:[%s968_s2 + $0x30] sm:$0xff] }
   0x6   :  { %692 = vmatmul.mubr.msk.f32.vlgmr.msra.gmra.mxu1 %vm44_vm1, %v243_v5  ;;  %668 = vmatprep.mubr.msk.f32.mxu0 %vm44_vm1, %v29_v6  ;;  %v246_v11 = vld [vmem:[%s970_s4 + $0x20] sm:$0xff]  ;;  %v248_v15 = vld [vmem:[%s970_s4 + $0x30] sm:$0xff] }
   0x7   :  { %694 = vmatprep.mubr.msk.f32.mxu1 %vm44_vm1, %v244_v7 }
   0x9   :  { %669 = vmatmul.mubr.msk.f32.gmra.mxu0 %vm44_vm1, %v30_v8 }
   0xa   :  { %695 = vmatmul.mubr.msk.f32.gmra.mxu1 %vm44_vm1, %v245_v9  ;;  %671 = vmatprep.mubr.msk.f32.mxu0 %vm44_vm1, %v31_v10 }
   0xb   :  { %697 = vmatprep.mubr.msk.f32.mxu1 %vm44_vm1, %v246_v11 }
   0xc   :  { %10 = vsyncpa [#allocation4], 0  ;;  %v34_v16 = vld [vmem:[%s968_s2 + $0x38] sm:$0xff]  ;;  %v35_v18 = vld [vmem:[%s968_s2 + $0x40] sm:$0xff]  ;;  %s775_s7 = smov [#allocation3]  }
   0xd   :  { %672 = vmatmul.mubr.msk.f32.gmra.mxu0 %vm44_vm1, %v32_v12  ;;  %v249_v17 = vld [vmem:[%s970_s4 + $0x38] sm:$0xff]  ;;  %v250_v19 = vld [vmem:[%s970_s4 + $0x40] sm:$0xff]  ;;  %v36_v20 = vld [vmem:[%s968_s2 + $0x48] sm:$0xff]  ;;  %s566_s8 = sshll.u32 %s775_s7, 4  ;;  %s567_s8 = int_to_ptr.vmem [resolvable:$true] %s566_s8 }
   0xe   :  { %698 = vmatmul.mubr.msk.f32.gmra.mxu1 %vm44_vm1, %v247_v13  ;;  %674 = vmatprep.mubr.msk.f32.mxu0 %vm44_vm1, %v33_v14  ;;  %v251_v21 = vld [vmem:[%s970_s4 + $0x48] sm:$0xff]  ;;  %v37_v22 = vld [vmem:[%s968_s2 + $0x50] sm:$0xff]  ;;  %v38_v24 = vld [vmem:[%s968_s2 + $0x58] sm:$0xff]  ;;  %s753_s9 = scalar_lea.vmem %s567_s8, 256  ;;  %p758_p1 = scmp.lt.s32.totalorder %s567_s8, %s567_s8 }
   0xf   :  { %700 = vmatprep.mubr.msk.f32.mxu1 %vm44_vm1, %v248_v15  ;;  %v252_v23 = vld [vmem:[%s970_s4 + $0x50] sm:$0xff]  ;;  %v253_v25 = vld [vmem:[%s970_s4 + $0x58] sm:$0xff]  ;;  %v39_v26 = vld [vmem:[%s968_s2 + $0x60] sm:$0xff]  ;;  %p754_p0 = scmp.ne.s32.totalorder %s567_s8, %s753_s9  ;;  %p759_p2 = scmp.lt.s32.totalorder %s753_s9, %s753_s9 }
  0x10   :  { %v254_v27 = vld [vmem:[%s970_s4 + $0x60] sm:$0xff]  ;;  %v40_v28 = vld [vmem:[%s968_s2 + $0x68] sm:$0xff]  ;;  %v41_v30 = vld [vmem:[%s968_s2 + $0x70] sm:$0xff] }
  0x11   :  { %675 = vmatmul.mubr.msk.f32.gmra.mxu0 %vm44_vm1, %v34_v16  ;;  %v255_v29 = vld [vmem:[%s970_s4 + $0x68] sm:$0xff]  ;;  %v256_v31 = vld [vmem:[%s970_s4 + $0x70] sm:$0xff]  ;;  %v42_v32 = vld [vmem:[%s968_s2 + $0x78] sm:$0xff]  ;;  %p760_p3 = por %p759_p2, %p758_p1 }
  0x12   :  { %701 = vmatmul.mubr.msk.f32.gmra.mxu1 %vm44_vm1, %v249_v17  ;;  %677 = vmatprep.mubr.msk.f32.mxu0 %vm44_vm1, %v35_v18  ;;  %v257_v33 = vld [vmem:[%s970_s4 + $0x78] sm:$0xff]  ;;  %v473_v34 = vld [vmem:[%s966_s0] sm:$0xff] }
  0x13   :  { %703 = vmatprep.mubr.msk.f32.mxu1 %vm44_vm1, %v250_v19  ;;  %v474_v19 = vld [vmem:[%s966_s0 + $0x8] sm:$0xff]  ;;  %p761_p4 = pnand %p760_p3, %p754_p0 }
  0x15   :  { %678 = vmatmul.mubr.msk.f32.gmra.mxu0 %vm44_vm1, %v36_v20 }
  0x16   :  { %704 = vmatmul.mubr.msk.f32.gmra.mxu1 %vm44_vm1, %v251_v21  ;;  %680 = vmatprep.mubr.msk.f32.mxu0 %vm44_vm1, %v37_v22 }
  0x17   :  { %706 = vmatprep.mubr.msk.f32.mxu1 %vm44_vm1, %v252_v23 }
  0x19   :  { %681 = vmatmul.mubr.msk.f32.gmra.mxu0 %vm44_vm1, %v38_v24 }
  0x1a   :  { %707 = vmatmul.mubr.msk.f32.gmra.mxu1 %vm44_vm1, %v253_v25  ;;  %683 = vmatprep.mubr.msk.f32.mxu0 %vm44_vm1, %v39_v26 }
  0x1b   :  { %709 = vmatprep.mubr.msk.f32.mxu1 %vm44_vm1, %v254_v27 }
  0x1d   :  { %684 = vmatmul.mubr.msk.f32.gmra.mxu0 %vm44_vm1, %v40_v28 }
  0x1e   :  { %710 = vmatmul.mubr.msk.f32.gmra.mxu1 %vm44_vm1, %v255_v29  ;;  %686 = vmatprep.mubr.msk.f32.mxu0 %vm44_vm1, %v41_v30 }
  0x1f   :  { %712 = vmatprep.mubr.msk.f32.mxu1 %vm44_vm1, %v256_v31 }
  0x21   :  { %687 = vmatmul.mubr.msk.f32.gmra.mxu0 %vm44_vm1, %v42_v32 }
  0x22   :  { %713 = vmatmul.mubr.msk.f32.gmra.mxu1 %vm44_vm1, %v257_v33  ;;  %747 = vmatprep.mubr.f32.mxu0 %v473_v34 }
  0xc5   :  { %v945_v35 = vpop.f32.mrf.mxu0 }
  0xc6   :  { %v947_v36 = vpop.f32.mrf.mxu1 }
  0xc7   :  { %v949_v37 = vpop.f32.mrf.mxu0  ;;  %v456_v17 = vmul.f32 %v947_v36, %v945_v35 }
  0xc8   :  { %v951_v38 = vpop.f32.mrf.mxu1 }
  0xc9   :  { %v670_v39 = vpop.f32.mrf.mxu0  ;;  %v455_v18 = vmul.f32 %v951_v38, %v949_v37 }
  0xca   :  { %v696_v40 = vpop.f32.mrf.mxu1 }
  0xcb   :  { %v953_v41 = vpop.f32.mrf.mxu0  ;;  %v458_v15 = vmul.f32 %v696_v40, %v670_v39 }
  0xcc   :  { %v386_v42 = vpop.f32.mrf.mxu1 }
  0xcd   :  { %v673_v43 = vpop.f32.mrf.mxu0  ;;  %v457_v16 = vmul.f32 %v386_v42, %v953_v41 }
  0xce   :  { %v699_v44 = vpop.f32.mrf.mxu1 }
  0xcf   :  { %v183_v45 = vpop.f32.mrf.mxu0  ;;  %v460_v13 = vmul.f32 %v699_v44, %v673_v43 }
  0xd0   :  { %v396_v46 = vpop.f32.mrf.mxu1 }
  0xd1   :  { %v676_v47 = vpop.f32.mrf.mxu0  ;;  %v459_v14 = vmul.f32 %v396_v46, %v183_v45 }
  0xd2   :  { %v702_v48 = vpop.f32.mrf.mxu1 }
  0xd3   :  { %v193_v49 = vpop.f32.mrf.mxu0  ;;  %v462_v11 = vmul.f32 %v702_v48, %v676_v47 }
  0xd4   :  { %v406_v50 = vpop.f32.mrf.mxu1 }
  0xd5   :  { %v679_v51 = vpop.f32.mrf.mxu0  ;;  %v461_v12 = vmul.f32 %v406_v50, %v193_v49 }
  0xd6   :  { %v705_v52 = vpop.f32.mrf.mxu1 }
  0xd7   :  { %v203_v53 = vpop.f32.mrf.mxu0  ;;  %v464_v9 = vmul.f32 %v705_v52, %v679_v51 }
  0xd8   :  { %v416_v54 = vpop.f32.mrf.mxu1 }
  0xd9   :  { %v682_v55 = vpop.f32.mrf.mxu0  ;;  %v463_v10 = vmul.f32 %v416_v54, %v203_v53 }
  0xda   :  { %v708_v56 = vpop.f32.mrf.mxu1 }
  0xdb   :  { %v213_v57 = vpop.f32.mrf.mxu0  ;;  %v466_v7 = vmul.f32 %v708_v56, %v682_v55 }
  0xdc   :  { %v426_v58 = vpop.f32.mrf.mxu1 }
  0xdd   :  { %v685_v59 = vpop.f32.mrf.mxu0  ;;  %v465_v8 = vmul.f32 %v426_v58, %v213_v57 }
  0xde   :  { %v711_v60 = vpop.f32.mrf.mxu1 }
  0xdf   :  { %v223_v61 = vpop.f32.mrf.mxu0  ;;  %v468_v5 = vmul.f32 %v711_v60, %v685_v59 }
  0xe0   :  { %v436_v62 = vpop.f32.mrf.mxu1 }
  0xe1   :  { %v688_v63 = vpop.f32.mrf.mxu0  ;;  %v467_v6 = vmul.f32 %v436_v62, %v223_v61 }
  0xe2   :  { %v714_v0 = vpop.f32.mrf.mxu1 }
  0xe3   :  { %v470_v1 = vmul.f32 %v714_v0, %v688_v63  ;;  %v233_v2 = vpop.f32.mrf.mxu0 }
  0xe4   :  { %v446_v3 = vpop.f32.mrf.mxu1 }
  0xe5   :  { %v469_v4 = vmul.f32 %v446_v3, %v233_v2  ;;  %715 = vmatprep.subr.mxu0 %v470_v1 }
  0xe6   :  { %716 = vmatpush3.msra.mxu0 %v470_v1 }
  0xe7   :  { %717 = vmatprep.subr.mxu0 %v469_v4 }
  0xe8   :  { %718 = vmatpush3.msra.mxu0 %v469_v4 }
  0xe9   :  { %719 = vmatprep.subr.mxu0 %v468_v5 }
  0xea   :  { %720 = vmatpush3.msra.mxu0 %v468_v5 }
  0xeb   :  { %721 = vmatprep.subr.mxu0 %v467_v6 }
  0xec   :  { %722 = vmatpush3.msra.mxu0 %v467_v6 }
  0xed   :  { %723 = vmatprep.subr.mxu0 %v466_v7 }
  0xee   :  { %724 = vmatpush3.msra.mxu0 %v466_v7 }
  0xef   :  { %725 = vmatprep.subr.mxu0 %v465_v8 }
  0xf0   :  { %726 = vmatpush3.msra.mxu0 %v465_v8 }
  0xf1   :  { %727 = vmatprep.subr.mxu0 %v464_v9 }
  0xf2   :  { %728 = vmatpush3.msra.mxu0 %v464_v9 }
  0xf3   :  { %729 = vmatprep.subr.mxu0 %v463_v10 }
  0xf4   :  { %730 = vmatpush3.msra.mxu0 %v463_v10 }
  0xf5   :  { %731 = vmatprep.subr.mxu0 %v462_v11 }
  0xf6   :  { %732 = vmatpush3.msra.mxu0 %v462_v11 }
  0xf7   :  { %733 = vmatprep.subr.mxu0 %v461_v12 }
  0xf8   :  { %734 = vmatpush3.msra.mxu0 %v461_v12 }
  0xf9   :  { %735 = vmatprep.subr.mxu0 %v460_v13 }
  0xfa   :  { %736 = vmatpush3.msra.mxu0 %v460_v13 }
  0xfb   :  { %737 = vmatprep.subr.mxu0 %v459_v14 }
  0xfc   :  { %738 = vmatpush3.msra.mxu0 %v459_v14 }
  0xfd   :  { %739 = vmatprep.subr.mxu0 %v458_v15 }
  0xfe   :  { %740 = vmatpush3.msra.mxu0 %v458_v15 }
  0xff   :  { %741 = vmatprep.subr.mxu0 %v457_v16 }
 0x100   :  { %742 = vmatpush3.msra.mxu0 %v457_v16 }
 0x101   :  { %743 = vmatprep.subr.mxu0 %v456_v17 }
 0x102   :  { %744 = vmatpush3.msra.mxu0 %v456_v17 }
 0x103   :  { %745 = vmatprep.subr.mxu0 %v455_v18 }
 0x104   :  { %746 = vmatpush3.msra.mxu0 %v455_v18 }
 0x105   :  { %748 = vmatmul.mubr.f32.vlgmr.msra.gmra.mxu0 %v474_v19 }
 0x1c5   :  { %v749_v20 = vpop.f32.mrf.mxu0 }
 0x1c6   :  { %560 = vst [vmem:[#allocation3 + $0x8] sm:$0xff] %v749_v20 }
 0x1c7   :  { %v541_v21 = vpop.f32.mrf.mxu0 }
 0x1c8   :  { %559 = vst [vmem:[#allocation3] sm:$0xff] %v541_v21 }
 0x1c9   :  { %764 = shalt.err (!%p761_p4)
}
 0x1ca   :  { %s776_s10 = smov 128   ;;  %s777_s11 = smov 8  }
 0x1cb   :  { %572 = dma.vmem_to_hbm [thread:$0]  %s567_s8, 256, %s971_s5, [#allocation4], %s776_s10, %s776_s10, %s777_s11  }
 0x1cc   :  { %773 = dma.done.wait [#allocation4], 256  }
 0x1cd   :  { %774 = vsyncadd [#allocation4], 4294967040 }
 0x1ce   :  { %576 = vsyncpa [#allocation4], 1 }

</bundles_post_ra>
